<compile_context>
chip_gen: v6e
topology: v6e:2x2x1
jax: 0.10.0
libtpu: 0.0.40
codegen_flags: <defaults>
</compile_context>

<pallas_src>
import jax
import jax.numpy as jnp
import numpy as np
from jax.experimental import pallas as pl
from jax.experimental.pallas import tpu as pltpu


_LANES = 128          # TPU vreg lane width; last block dim is always 128.
_MAX_TILE_ROWS = 512  # (512, 128) f32 block = 256 KiB; ~85% of HBM roofline,
                      # tiny vs scoped VMEM on v5e/v6e/v7x even double-buffered.


def _round_up(n: int, m: int) -> int:
    return ((n + m - 1) // m) * m


def _identity_kernel(x_ref, o_ref):
    # Pure pass-through: copy the current lane-dense tile in one shot.
    o_ref[...] = x_ref[...]


def deepconvnet_forward(x: jax.Array) -> jax.Array:
    """Pallas translation of DeepConvNet.forward (a stub / no-op).

    Fastest correct implementation would simply be `return x`; the Pallas
    identity copy below is kept as the kernel template and is structured to
    be lane-dense, row-tiled, and VMEM-safe on v5e / v6e / v7x.
    """
    orig_shape = x.shape
    orig_dtype = x.dtype
    total = x.size

    # ---- lane-dense (rows, 128) view, zero-padded if needed -------------
    rows_needed = -(-total // _LANES)                 # ceil(total / 128)
    tile_rows = min(_MAX_TILE_ROWS, _round_up(rows_needed, 8))
    rows = _round_up(rows_needed, tile_rows)          # grid divides evenly
    padded_total = rows * _LANES

    x_flat = x.reshape(total)
    if padded_total != total:
        x_flat = jnp.pad(x_flat, (0, padded_total - total))
    x2d = x_flat.reshape(rows, _LANES)

    grid = (rows // tile_rows,)
    block = (tile_rows, _LANES)

    out2d = pl.pallas_call(
        _identity_kernel,
        out_shape=jax.ShapeDtypeStruct(x2d.shape, x2d.dtype),
        grid=grid,
        in_specs=[pl.BlockSpec(block, lambda i: (i, 0))],
        out_specs=pl.BlockSpec(block, lambda i: (i, 0)),
        compiler_params=pltpu.CompilerParams(
            # Memory-bound copy: shard row tiles across both TensorCores on
            # v7x; harmless on single-TC v5e/v6e.
            dimension_semantics=("parallel",),
            # Small blocks -> well under every generation's scoped default,
            # but state the budget explicitly with headroom.
            vmem_limit_bytes=32 << 20,
        ),
        # Pure memory op: zero flops, 2x bytes (read + write).
        cost_estimate=pl.CostEstimate(
            flops=0, transcendentals=0, bytes_accessed=2 * x.nbytes
        ),
    )(x2d)

    out_flat = out2d.reshape(padded_total)
    if padded_total != total:
        out_flat = out_flat[:total]
    return out_flat.reshape(orig_shape).astype(orig_dtype)


if __name__ == "__main__":
    key = jax.random.PRNGKey(0)
    # Small NCHW input consistent with an EEG-style 4D tensor.
    # 2 * 4 * 16 * 16 = 2048 elements -> lane-dense (16, 128) blocks.
    x = jax.random.normal(key, (2, 4, 16, 16), dtype=jnp.float32)

    # Host-side reference copy taken BEFORE the kernel runs (so the check is
    # meaningful even if the output ever aliases the input).
    x_host = np.array(jax.device_get(x))

    y = deepconvnet_forward(x)
    y = jax.block_until_ready(y)

    # Sanity check: identity pass-through must match the pre-kernel input.
    assert y.shape == x.shape and y.dtype == x.dtype
    assert np.array_equal(np.array(jax.device_get(y)), x_host)

    print("KERNEL_OK")
</pallas_src>

<mosaic_0001>
module attributes {stable_mosaic.version = 11 : i64} {
  func.func @_identity_kernel(%arg0: i32, %arg1: memref<16x128xf32, #tpu.memory_space<vmem>>, %arg2: memref<16x128xf32, #tpu.memory_space<vmem>>) attributes {dimension_semantics = [#tpu.dimension_semantics<parallel>], iteration_bounds = array<i64: 1>, scalar_prefetch = 0 : i64, scratch_operands = 0 : i64, tpu.core_type = #tpu.core_type<tc>, window_params = [{transform_indices = @transform_0, window_bounds = array<i64: 16, 128>}, {transform_indices = @transform_1, window_bounds = array<i64: 16, 128>}]} {
    %c0 = arith.constant 0 : index
    %c0_0 = arith.constant 0 : index
    %0 = vector.load %arg1[%c0, %c0_0] : memref<16x128xf32, #tpu.memory_space<vmem>>, vector<16x128xf32>
    %c0_1 = arith.constant 0 : index
    %c0_2 = arith.constant 0 : index
    %1 = vector.load %arg2[%c0_1, %c0_2] : memref<16x128xf32, #tpu.memory_space<vmem>>, vector<16x128xf32>
    tpu.vector_store %arg2[%c0_1, %c0_2], %0 {strides = array<i32>} : memref<16x128xf32, #tpu.memory_space<vmem>>, vector<16x128xf32>,
    return
  }
  func.func @transform_0(%arg0: i32) -> (i32, i32) {
    %c0_i32 = arith.constant 0 : i32
    %c0_i32_0 = arith.constant 0 : i32
    return %arg0, %c0_i32 : i32, i32
  }
  func.func @transform_1(%arg0: i32) -> (i32, i32) {
    %c0_i32 = arith.constant 0 : i32
    %c0_i32_0 = arith.constant 0 : i32
    return %arg0, %c0_i32 : i32, i32
  }
}

</mosaic_0001>

<bundles_post_ra>
// kernel: tpu_custom_call.1
= control target key start
LH: loop header
LB: loop body
LE: loop exit
PB: predicated region body
PF: predicated region fallthrough
CT: control target
= control target key end

     0   :  { %6 = vsyncpa [#allocation3], 0  ;;  %s112_s0 = inlined_call_operand.hbm [shape: f32[16,128], index: 0, kind: input, shape index: {}]   ;;  %s113_s1 = inlined_call_operand.hbm [shape: f32[16,128], index: 1, kind: output, shape index: {}]  }
   0x1   :  { %7 = vsyncpa [#allocation4], 0  ;;  %s92_s6 = smov [#allocation2]  }
   0x2   :  { %s13_s7 = sshll.u32 %s92_s6, 4  ;;  %s14_s7 = int_to_ptr.vmem [resolvable:$true] %s13_s7 }
   0x3   :  { %s56_s8 = scalar_lea.vmem %s14_s7, 256  ;;  %p61_p1 = scmp.lt.s32.totalorder %s14_s7, %s14_s7 }
   0x4   :  { %p57_p0 = scmp.ne.s32.totalorder %s14_s7, %s56_s8  ;;  %p62_p2 = scmp.lt.s32.totalorder %s56_s8, %s56_s8 }
   0x6   :  { %p63_p3 = por %p62_p2, %p61_p1 }
   0x8   :  { %p64_p4 = pnand %p63_p3, %p57_p0 }
   0xa   :  { %67 = shalt.err (!%p64_p4)
}
   0xb   :  { %s93_s9 = smov 128   ;;  %s94_s10 = smov 8  }
   0xc   :  { %19 = dma.hbm_to_vmem [thread:$0]  %s112_s0, 256, %s14_s7, [#allocation3], %s93_s9, %s93_s9, %s94_s10  }
   0xd   :  { %88 = dma.done.wait [#allocation3], 256  }
   0xe   :  { %89 = vsyncadd [#allocation3], 4294967040  ;;  %s95_s13 = smov [#allocation5]   ;;  %v23_v0 = vld [vmem:[#allocation2] sm:$0xff]  ;;  %v24_v1 = vld [vmem:[#allocation2 + $0x8] sm:$0xff] }
   0xf   :  { %s32_s14 = sshll.u32 %s95_s13, 4  ;;  %25 = vst [vmem:[#allocation5] sm:$0xff] %v23_v0  ;;  %26 = vst [vmem:[#allocation5 + $0x8] sm:$0xff] %v24_v1  ;;  %s33_s14 = int_to_ptr.vmem [resolvable:$true] %s32_s14 }
  0x10   :  { %s68_s15 = scalar_lea.vmem %s33_s14, 256  ;;  %p73_p6 = scmp.lt.s32.totalorder %s33_s14, %s33_s14 }
  0x11   :  { %p69_p5 = scmp.ne.s32.totalorder %s33_s14, %s68_s15  ;;  %p74_p7 = scmp.lt.s32.totalorder %s68_s15, %s68_s15 }
  0x13   :  { %p75_p8 = por %p74_p7, %p73_p6 }
  0x15   :  { %p76_p9 = pnand %p75_p8, %p69_p5 }
  0x17   :  { %79 = shalt.err (!%p76_p9)
}
  0x18   :  { %38 = dma.vmem_to_hbm [thread:$0]  %s33_s14, 256, %s113_s1, [#allocation4], %s93_s9, %s93_s9, %s94_s10  }
  0x19   :  { %90 = dma.done.wait [#allocation4], 256  }
  0x1a   :  { %91 = vsyncadd [#allocation4], 4294967040 }
  0x1b   :  { %42 = vsyncpa [#allocation3], 1 }
  0x1c   :  { %43 = vsyncpa [#allocation4], 1 }

</bundles_post_ra>
